<compile_context>
chip_gen: v7x
topology: tpu7x:2x2x1
jax: 0.10.0
libtpu: 0.0.40
codegen_flags: <defaults>
</compile_context>

<pallas_src>
import functools

import jax
import jax.numpy as jnp
from jax.experimental import pallas as pl
from jax.experimental.pallas import tpu as pltpu

BN_EPS = 1e-5
NUM_CLASSES = 10


# ----------------------------------------------------------------------------
# Pallas kernel: (M,K) x (K,TN) bf16 MXU matmul + bias [+ ReLU] [+ BatchNorm]
# ----------------------------------------------------------------------------
def _fused_matmul_kernel(a_ref, w_ref, s_ref, o_ref, *, relu, bn, m_rows, eps):
    # bf16 operands -> f32 accumulate on the MXU.  w_ref block is (1, K, TN):
    # one contiguous pre-tiled weight slab per grid step.
    y = jnp.dot(a_ref[...], w_ref[0], preferred_element_type=jnp.float32)
    y = y + s_ref[0:1, :]                      # bias
    if relu:
        y = jnp.maximum(y, 0.0)
    if bn:
        # PyTorch BatchNorm2d training-mode semantics: per-channel batch mean,
        # biased variance over the M = N*H*W rows (channels on the lane axis).
        # Single pass: E[y], E[y^2]; gamma folded into one per-channel scale.
        inv_m = 1.0 / m_rows
        s1 = jnp.sum(y, axis=0, keepdims=True)
        s2 = jnp.sum(y * y, axis=0, keepdims=True)
        mean = s1 * inv_m
        var = jnp.maximum(s2 * inv_m - mean * mean, 0.0)
        scale = jax.lax.rsqrt(var + eps) * s_ref[1:2, :]     # gamma / sqrt(var+eps)
        shift = s_ref[2:3, :] - mean * scale                 # beta - mean*scale
        y = y * scale + shift
    o_ref[...] = y.astype(o_ref.dtype)


def _pick_tn(n):
    """Cout tile width.  256-wide tiles for wide layers (256x256 MXU on
    v6e/v7x); on single-TC v6e also widen the Cout=256 layers; 128 otherwise;
    full-dim for small Cout (64, padded-128)."""
    try:
        kind = jax.devices()[0].device_kind.lower()
    except Exception:  # pragma: no cover - defensive
        kind = ""
    if n % 256 == 0 and (n >= 512 or "v6" in kind):
        return 256
    if n % 128 == 0:
        return 128
    return n


def fused_matmul(a_bf16, w_tiled, side, *, relu, bn, out_dtype):
    """a: (M,K) bf16, w_tiled: (N//tn, K, tn) bf16, side: (3,N) f32
    (rows = bias, gamma, beta) -> (M, N) out_dtype."""
    m, k = a_bf16.shape
    nt, _, tn = w_tiled.shape
    n = nt * tn
    out_bytes = m * n * jnp.dtype(out_dtype).itemsize

    return pl.pallas_call(
        functools.partial(_fused_matmul_kernel, relu=relu, bn=bn,
                          m_rows=float(m), eps=BN_EPS),
        out_shape=jax.ShapeDtypeStruct((m, n), out_dtype),
        grid_spec=pltpu.PrefetchScalarGridSpec(
            num_scalar_prefetch=0,
            grid=(nt,),
            in_specs=[
                pl.BlockSpec((m, k), lambda j: (0, 0)),       # A: resident full M,K
                pl.BlockSpec((1, k, tn), lambda j: (j, 0, 0)),  # W: contiguous Cout tile
                pl.BlockSpec((3, tn), lambda j: (0, j)),      # packed bias/gamma/beta
            ],
            out_specs=pl.BlockSpec((m, tn), lambda j: (0, j)),
        ),
        compiler_params=pltpu.CompilerParams(
            dimension_semantics=("parallel",),
            vmem_limit_bytes=32 * 1024 * 1024),
        cost_estimate=pl.CostEstimate(
            flops=2 * m * k * n,
            transcendentals=0,
            bytes_accessed=2 * m * k + 2 * k * n + 12 * n + out_bytes),
    )(a_bf16, w_tiled, side)


# ----------------------------------------------------------------------------
# Pallas kernel: ConvTranspose2d(k=3, s=2, p=1, op=1) as 4 dense parity dots
# ----------------------------------------------------------------------------
def _convT_kernel(a_ref, w_ref, b_ref, o_ref, *, cin, cout):
    c = cout
    # Tap groups (columns of A): [x(r,c) | x(r,c+1) | x(r+1,c) | x(r+1,c+1)]
    a0 = a_ref[:, 0 * cin:1 * cin]
    a1 = a_ref[:, 1 * cin:2 * cin]
    a2 = a_ref[:, 2 * cin:3 * cin]
    a3 = a_ref[:, 3 * cin:4 * cin]
    # Dense weight layout (Cin, 9*Cout):
    #   [:4c] taps of x(r,c)    -> parities (0,0),(0,1),(1,0),(1,1)
    #   [4c:6c] x(r,c+1)        -> parities (0,1),(1,1)
    #   [6c:8c] x(r+1,c)        -> parities (1,0),(1,1)
    #   [8c:9c] x(r+1,c+1)      -> parity  (1,1)
    y0 = jnp.dot(a0, w_ref[:, 0 * c:4 * c], preferred_element_type=jnp.float32)
    y1 = jnp.dot(a1, w_ref[:, 4 * c:6 * c], preferred_element_type=jnp.float32)
    y2 = jnp.dot(a2, w_ref[:, 6 * c:8 * c], preferred_element_type=jnp.float32)
    y3 = jnp.dot(a3, w_ref[:, 8 * c:9 * c], preferred_element_type=jnp.float32)
    p00 = y0[:, 0 * c:1 * c]
    p01 = y0[:, 1 * c:2 * c] + y1[:, 0 * c:1 * c]
    p10 = y0[:, 2 * c:3 * c] + y2[:, 0 * c:1 * c]
    p11 = y0[:, 3 * c:4 * c] + y1[:, 1 * c:2 * c] + y2[:, 1 * c:2 * c] + y3
    y = jnp.concatenate([p00, p01, p10, p11], axis=-1) + b_ref[...]
    o_ref[...] = y.astype(o_ref.dtype)


# ----------------------------------------------------------------------------
# Conv / ConvTranspose / MaxPool wrappers (tiny bf16 XLA glue around kernels)
# ----------------------------------------------------------------------------
def _im2col(xp, ho, wo):
    """xp: spatially pre-padded (N, Hp, Wp, C) bf16 -> (N*ho*wo, 9*C), (kh,kw,ci) row order."""
    n, _, _, c = xp.shape
    patches = jnp.stack(
        [xp[:, kh:kh + ho, kw:kw + wo, :] for kh in range(3) for kw in range(3)],
        axis=3)                                          # (N, ho, wo, 9, C)
    return patches.reshape(n * ho * wo, 9 * c)


def conv3x3(x, w_tiled, side, *, relu=False, bn=False, out_dtype=jnp.bfloat16):
    """3x3 conv, stride 1, pad 1, fused bias/ReLU/BN.
    x: (N,H,W,Cin);  w_tiled: (Cout//tn, 9*Cin, tn) bf16;  side: (3,Cout) f32."""
    n, h, w, _ = x.shape
    nt, _, tn = w_tiled.shape
    cout = nt * tn
    xp = jnp.pad(x.astype(jnp.bfloat16), ((0, 0), (1, 1), (1, 1), (0, 0)))
    a = _im2col(xp, h, w)
    y = fused_matmul(a, w_tiled, side, relu=relu, bn=bn, out_dtype=out_dtype)
    return y.reshape(n, h, w, cout)


def conv_transpose3x3_s2(x, w_dense, bias4, *, out_dtype=jnp.bfloat16):
    """ConvTranspose2d(k=3, s=2, p=1, output_padding=1): (N,H,W,Cin)->(N,2H,2W,Cout)
    via the dense 4-parity decomposition (no zero-dilated input, no zero weight blocks)."""
    n, h, w, cin = x.shape
    cout = w_dense.shape[1] // 9
    m = n * h * w
    xb = x.astype(jnp.bfloat16)
    xp = jnp.pad(xb, ((0, 0), (0, 1), (0, 1), (0, 0)))   # halo for (r+1, c+1) taps
    taps = jnp.concatenate(
        [xp[:, :h, :w, :],            # x[r,   c  ]
         xp[:, :h, 1:w + 1, :],       # x[r,   c+1]
         xp[:, 1:h + 1, :w, :],       # x[r+1, c  ]
         xp[:, 1:h + 1, 1:w + 1, :]], # x[r+1, c+1]
        axis=-1)
    a = taps.reshape(m, 4 * cin)

    y = pl.pallas_call(
        functools.partial(_convT_kernel, cin=cin, cout=cout),
        out_shape=jax.ShapeDtypeStruct((m, 4 * cout), out_dtype),
        grid_spec=pltpu.PrefetchScalarGridSpec(
            num_scalar_prefetch=0,
            grid=(1,),
            in_specs=[
                pl.BlockSpec((m, 4 * cin), lambda j: (0, 0)),
                pl.BlockSpec((cin, 9 * cout), lambda j: (0, 0)),
                pl.BlockSpec((1, 4 * cout), lambda j: (0, 0)),
            ],
            out_specs=pl.BlockSpec((m, 4 * cout), lambda j: (0, 0)),
        ),
        compiler_params=pltpu.CompilerParams(
            dimension_semantics=("arbitrary",),
            vmem_limit_bytes=32 * 1024 * 1024),
        cost_estimate=pl.CostEstimate(
            flops=2 * m * 9 * cin * cout,
            transcendentals=0,
            bytes_accessed=2 * m * 4 * cin + 2 * 9 * cin * cout
                           + m * 4 * cout * jnp.dtype(out_dtype).itemsize),
    )(a, w_dense, bias4)

    # column groups are output parities (a,b) in order (0,0),(0,1),(1,0),(1,1)
    y = y.reshape(n, h, w, 2, 2, cout)
    y = jnp.transpose(y, (0, 1, 3, 2, 4, 5))             # (n, h, a, w, b, c)
    return y.reshape(n, 2 * h, 2 * w, cout)


def maxpool2x2(x):
    # glue: MaxPool2d(kernel=2, stride=2) as reshape+max in plain JAX
    n, h, w, c = x.shape
    return jnp.max(x.reshape(n, h // 2, 2, w // 2, 2, c), axis=(2, 4))


def conv_block(x, p):
    """Conv-ReLU-BN-Conv-ReLU-BN (UNet.conv_block); each conv is one fused kernel."""
    y = conv3x3(x, p['w1'], p['s1'], relu=True, bn=True)
    y = conv3x3(y, p['w2'], p['s2'], relu=True, bn=True)
    return y


# ----------------------------------------------------------------------------
# Parameter init (PyTorch layouts) + one-time bf16 repacking (outside jit)
# ----------------------------------------------------------------------------
def init_conv(key, cin, cout):
    k1, k2 = jax.random.split(key)
    w = jax.random.normal(k1, (cout, cin, 3, 3), jnp.float32) / jnp.sqrt(9.0 * cin)
    b = 0.01 * jax.random.normal(k2, (cout,), jnp.float32)
    return w, b


def init_convT(key, cin, cout):
    k1, k2 = jax.random.split(key)
    w = jax.random.normal(k1, (cin, cout, 3, 3), jnp.float32) / jnp.sqrt(9.0 * cin)
    b = 0.01 * jax.random.normal(k2, (cout,), jnp.float32)
    return w, b


def prep_conv(w_oihw, b, gamma=None, beta=None):
    """(Cout,Cin,3,3) f32 -> pre-tiled ((Cout//tn, 9*Cin, tn) bf16 in (kh,kw,ci)
    row order, contiguous per Cout tile) and packed (3, Cout) f32 side input."""
    cout = w_oihw.shape[0]
    tn = _pick_tn(cout)
    wm = jnp.transpose(w_oihw, (2, 3, 1, 0)).reshape(-1, cout)      # (9*Cin, Cout)
    k = wm.shape[0]
    w_tiled = wm.reshape(k, cout // tn, tn).transpose(1, 0, 2).astype(jnp.bfloat16)
    if gamma is None:
        gamma = jnp.ones((cout,), jnp.float32)
    if beta is None:
        beta = jnp.zeros((cout,), jnp.float32)
    side = jnp.stack([b.astype(jnp.float32), gamma, beta], axis=0)  # (3, Cout)
    return w_tiled, side


def prep_convT(w_iohw, b):
    """Pack ConvTranspose weight (Cin,Cout,3,3) into the DENSE 9-block parity
    matrix (Cin, 9*Cout): [x(r,c)->4 parities | x(r,c+1)->2 | x(r+1,c)->2 | x(r+1,c+1)->1]."""
    cout = w_iohw.shape[1]
    t = lambda kh, kw: w_iohw[:, :, kh, kw]              # (Cin, Cout)
    w_dense = jnp.concatenate([
        t(1, 1), t(1, 2), t(2, 1), t(2, 2),              # from x[r,   c  ]
        t(1, 0), t(2, 0),                                # from x[r,   c+1]
        t(0, 1), t(0, 2),                                # from x[r+1, c  ]
        t(0, 0),                                         # from x[r+1, c+1]
    ], axis=1).astype(jnp.bfloat16)                      # (Cin, 9*Cout)
    b4 = jnp.tile(b, 4).reshape(1, 4 * cout).astype(jnp.float32)
    return w_dense, b4


def init_block(key, cin, cout):
    k1, k2 = jax.random.split(key)
    w1, b1 = init_conv(k1, cin, cout)
    w2, b2 = init_conv(k2, cout, cout)
    w1t, s1 = prep_conv(w1, b1)
    w2t, s2 = prep_conv(w2, b2)
    return dict(w1=w1t, s1=s1, w2=w2t, s2=s2)


# ----------------------------------------------------------------------------
# Full UNet forward (NCHW in / NCHW out)
# ----------------------------------------------------------------------------
def unet_forward(x_nchw, params):
    x = jnp.transpose(x_nchw, (0, 2, 3, 1)).astype(jnp.bfloat16)   # NCHW -> NHWC bf16
    c11 = conv_block(x, params['c1'])
    c12 = maxpool2x2(c11)
    c21 = conv_block(c12, params['c2'])
    c22 = maxpool2x2(c21)
    c31 = conv_block(c22, params['c3'])
    c32 = maxpool2x2(c31)
    c41 = conv_block(c32, params['c4'])
    c42 = maxpool2x2(c41)
    mid = conv_block(c42, params['mid'])

    e11 = conv_transpose3x3_s2(mid, params['t1_w'], params['t1_b'])
    e12 = conv_block(jnp.concatenate([e11, c41], axis=-1), params['e1'])
    e21 = conv_transpose3x3_s2(e12, params['t2_w'], params['t2_b'])
    e22 = conv_block(jnp.concatenate([e21, c31], axis=-1), params['e2'])
    e31 = conv_transpose3x3_s2(e22, params['t3_w'], params['t3_b'])
    e32 = conv_block(jnp.concatenate([e31, c21], axis=-1), params['e3'])
    e41 = conv_transpose3x3_s2(e32, params['t4_w'], params['t4_b'])
    e42 = conv_block(jnp.concatenate([e41, c11], axis=-1), params['e4'])

    # final conv is padded to Cout=128 for lane-dense stores; slice back to 10
    out = conv3x3(e42, params['out_w'], params['out_s'],
                  relu=False, bn=False, out_dtype=jnp.float32)[..., :NUM_CLASSES]
    return jnp.transpose(out, (0, 3, 1, 2))              # NHWC -> NCHW


# ----------------------------------------------------------------------------
# Numerical validation helpers (packing / epilogue checks vs lax references)
# ----------------------------------------------------------------------------
def _check_close(got, want, name, tol=0.05):
    got = jnp.asarray(got, jnp.float32)
    want = jnp.asarray(want, jnp.float32)
    err = float(jnp.max(jnp.abs(got - want)))
    ref = float(jnp.max(jnp.abs(want))) + 1e-6
    assert err / ref < tol, f"{name}: relative error {err / ref:.4f} (tol {tol})"


if __name__ == "__main__":
    key = jax.random.PRNGKey(0)
    ks = jax.random.split(key, 18)

    # ---------------- packing / epilogue validation (bf16 tolerance) --------
    kc = jax.random.split(ks[15], 3)
    xv = jax.random.normal(kc[0], (2, 8, 8, 16), jnp.float32)
    wv = 0.1 * jax.random.normal(kc[1], (128, 16, 3, 3), jnp.float32)
    bv = 0.1 * jax.random.normal(kc[2], (128,), jnp.float32)
    wt_v, side_v = prep_conv(wv, bv)
    conv_plain = jax.jit(lambda a, b, c: conv3x3(a, b, c, relu=False, bn=False,
                                                 out_dtype=jnp.float32))
    conv_rbn = jax.jit(lambda a, b, c: conv3x3(a, b, c, relu=True, bn=True,
                                               out_dtype=jnp.float32))
    ref_c = jax.lax.conv_general_dilated(
        xv, jnp.transpose(wv, (2, 3, 1, 0)), (1, 1), ((1, 1), (1, 1)),
        dimension_numbers=('NHWC', 'HWIO', 'NHWC')) + bv
    _check_close(conv_plain(xv, wt_v, side_v), ref_c, "conv3x3")
    ref_r = jnp.maximum(ref_c, 0.0)
    mu = jnp.mean(ref_r, axis=(0, 1, 2), keepdims=True)
    va = jnp.var(ref_r, axis=(0, 1, 2), keepdims=True)
    ref_bn = (ref_r - mu) * jax.lax.rsqrt(va + BN_EPS)     # gamma=1, beta=0
    _check_close(conv_rbn(xv, wt_v, side_v), ref_bn, "conv3x3+relu+bn")

    kt = jax.random.split(ks[16], 3)
    xtv = jax.random.normal(kt[0], (2, 4, 4, 128), jnp.float32)
    wtv = 0.05 * jax.random.normal(kt[1], (128, 64, 3, 3), jnp.float32)   # (Cin,Cout,3,3)
    btv = 0.1 * jax.random.normal(kt[2], (64,), jnp.float32)
    wd_v, b4_v = prep_convT(wtv, btv)
    tconv = jax.jit(lambda a, b, c: conv_transpose3x3_s2(a, b, c,
                                                         out_dtype=jnp.float32))
    w_flip = jnp.transpose(wtv[:, :, ::-1, ::-1], (2, 3, 0, 1))           # HWIO, flipped
    ref_t = jax.lax.conv_general_dilated(
        xtv, w_flip, (1, 1), ((1, 2), (1, 2)), lhs_dilation=(2, 2),
        dimension_numbers=('NHWC', 'HWIO', 'NHWC')) + btv
    _check_close(tconv(xtv, wd_v, b4_v), ref_t, "conv_transpose3x3_s2")

    # ---------------- full UNet parameters ----------------------------------
    params = {
        'c1':  init_block(ks[0], 3, 64),
        'c2':  init_block(ks[1], 64, 128),
        'c3':  init_block(ks[2], 128, 256),
        'c4':  init_block(ks[3], 256, 512),
        'mid': init_block(ks[4], 512, 1024),
        'e1':  init_block(ks[5], 1024, 512),
        'e2':  init_block(ks[6], 512, 256),
        'e3':  init_block(ks[7], 256, 128),
        'e4':  init_block(ks[8], 128, 64),
    }
    for name, idx, cin, cout in [('t1', 9, 1024, 512), ('t2', 10, 512, 256),
                                 ('t3', 11, 256, 128), ('t4', 12, 128, 64)]:
        w, b = init_convT(ks[idx], cin, cout)
        params[name + '_w'], params[name + '_b'] = prep_convT(w, b)
    wo, bo = init_conv(ks[13], 64, NUM_CLASSES)
    wo_pad = jnp.zeros((128, 64, 3, 3), jnp.float32).at[:NUM_CLASSES].set(wo)
    bo_pad = jnp.zeros((128,), jnp.float32).at[:NUM_CLASSES].set(bo)
    params['out_w'], params['out_s'] = prep_conv(wo_pad, bo_pad)

    # small input: batch=2, 3 channels, 16x16 spatial (divisible by 2^4 for the pools)
    x = jax.random.normal(ks[14], (2, 3, 16, 16), jnp.float32)

    y = jax.jit(unet_forward)(x, params)
    jax.block_until_ready(y)
    assert y.shape == (2, NUM_CLASSES, 16, 16), y.shape
    assert bool(jnp.all(jnp.isfinite(y)))
    print("KERNEL_OK")
</pallas_src>

<mosaic_0001>
module attributes {stable_mosaic.version = 11 : i64} {
  func.func @_fused_matmul_kernel(%arg0: i32, %arg1: memref<128x144xbf16, #tpu.memory_space<vmem>>, %arg2: memref<1x144x128xbf16, #tpu.memory_space<vmem>>, %arg3: memref<3x128xf32, #tpu.memory_space<vmem>>, %arg4: memref<128x128xf32, #tpu.memory_space<vmem>>) attributes {dimension_semantics = [#tpu.dimension_semantics<parallel>], iteration_bounds = array<i64: 1>, scalar_prefetch = 0 : i64, scratch_operands = 0 : i64, tpu.core_type = #tpu.core_type<tc>, window_params = [{pipeline_mode = #tpu.pipeline_mode<synchronous>, transform_indices = @transform_0, window_bounds = array<i64: 128, 144>}, {transform_indices = @transform_1, window_bounds = array<i64: 1, 144, 128>}, {transform_indices = @transform_2, window_bounds = array<i64: 3, 128>}, {transform_indices = @transform_3, window_bounds = array<i64: 128, 128>}]} {
    %c0 = arith.constant 0 : index
    %c0_0 = arith.constant 0 : index
    %0 = vector.load %arg1[%c0, %c0_0] : memref<128x144xbf16, #tpu.memory_space<vmem>>, vector<128x144xbf16>
    %c0_1 = arith.constant 0 : index
    %c0_2 = arith.constant 0 : index
    %c0_3 = arith.constant 0 : index
    %1 = vector.load %arg2[%c0_1, %c0_2, %c0_3] : memref<1x144x128xbf16, #tpu.memory_space<vmem>>, vector<1x144x128xbf16>
    %2 = vector.shape_cast %1 : vector<1x144x128xbf16> to vector<144x128xbf16>
    %cst = arith.constant dense<0.000000e+00> : vector<128x128xf32>
    %3 = tpu.matmul %0, %2, %cst {dimension_numbers = #tpu.dot_dimension_numbers<[1], [0], [0], [1], [0, 0, 1, 1], [], []>} : vector<128x144xbf16>, vector<144x128xbf16>, vector<128x128xf32> -> vector<128x128xf32>
    %c0_4 = arith.constant 0 : index
    %c0_5 = arith.constant 0 : index
    %4 = vector.load %arg3[%c0_4, %c0_5] : memref<3x128xf32, #tpu.memory_space<vmem>>, vector<1x128xf32>
    %5 = vector.broadcast %4 : vector<1x128xf32> to vector<128x128xf32>
    %6 = arith.addf %3, %5 : vector<128x128xf32>
    %c0_6 = arith.constant 0 : index
    %c0_7 = arith.constant 0 : index
    %7 = vector.load %arg4[%c0_6, %c0_7] : memref<128x128xf32, #tpu.memory_space<vmem>>, vector<128x128xf32>
    tpu.vector_store %arg4[%c0_6, %c0_7], %6 {strides = array<i32>} : memref<128x128xf32, #tpu.memory_space<vmem>>, vector<128x128xf32>,
    return
  }
  func.func @transform_0(%arg0: i32) -> (i32, i32) {
    %c0_i32 = arith.constant 0 : i32
    %c0_i32_0 = arith.constant 0 : i32
    %c0_i32_1 = arith.constant 0 : i32
    return %c0_i32, %c0_i32_0 : i32, i32
  }
  func.func @transform_1(%arg0: i32) -> (i32, i32, i32) {
    %c0_i32 = arith.constant 0 : i32
    %c0_i32_0 = arith.constant 0 : i32
    %c0_i32_1 = arith.constant 0 : i32
    return %arg0, %c0_i32, %c0_i32_0 : i32, i32, i32
  }
  func.func @transform_2(%arg0: i32) -> (i32, i32) {
    %c0_i32 = arith.constant 0 : i32
    %c0_i32_0 = arith.constant 0 : i32
    return %c0_i32, %arg0 : i32, i32
  }
  func.func @transform_3(%arg0: i32) -> (i32, i32) {
    %c0_i32 = arith.constant 0 : i32
    %c0_i32_0 = arith.constant 0 : i32
    return %c0_i32, %arg0 : i32, i32
  }
}

</mosaic_0001>

<bundles_post_ra>
// kernel: _lambda_.1
= control target key start
LH: loop header
LB: loop body
LE: loop exit
PB: predicated region body
PF: predicated region fallthrough
CT: control target
= control target key end

     0   :  { %v448_v1 = vmov 0   ;;  %vm181_vm0 = vcmask 130048   ;;  %s588_s0 = inlined_call_operand.vmem [shape: bf16[128,144], index: 0, kind: input, shape index: {}]   ;;  %s589_s1 = inlined_call_operand.vmem [shape: bf16[1,144,128], index: 1, kind: input, shape index: {}]   ;;  %s590_s2 = inlined_call_operand.vmem [shape: f32[3,128], index: 2, kind: input, shape index: {}]   ;;  %s591_s3 = inlined_call_operand.hbm [shape: f32[128,128], index: 3, kind: output, shape index: {}]  }
   0x1   :  { %v391_v0 = vld [vmem:[%s589_s1] sm:$0xff]   ;;  %206 = vmatprep.subr.bf16.mxu0 %v448_v1  ;;  %369 = vmatprep.subr.bf16.mxu1 %v448_v1  ;;  %v392_v2 = vld [vmem:[%s589_s1 + $0x8] sm:$0xff]   ;;  %v393_v3 = vld [vmem:[%s589_s1 + $0x10] sm:$0xff]  }
   0x2   :  { %207 = vmatpush1.bf16.msra.mxu0 %v391_v0  ;;  %378 = vmatpush1.bf16.msra.mxu1 %v391_v0  ;;  %v394_v4 = vld [vmem:[%s589_s1 + $0x18] sm:$0xff]   ;;  %v402_v5 = vld [vmem:[%s588_s0 + $0x4] ss:$8 sps:$4 sm:$0xff]  }
   0x3   :  { %208 = vmatprep.subr.bf16.mxu0 %v448_v1  ;;  %370 = vmatprep.subr.bf16.mxu1 %v448_v1  ;;  %v405_v6 = vld [vmem:[%s588_s0 + $0x44] ss:$8 sps:$4 sm:$0xff]  }
   0x4   :  { %361 = vmatprep.mubr.msk.bf16.mxu0 %vm181_vm0, %v402_v5  ;;  %365 = vmatprep.mubr.msk.bf16.mxu1 %vm181_vm0, %v405_v6  ;;  %v395_v7 = vld [vmem:[%s589_s1 + $0x20] sm:$0xff]   ;;  %v396_v8 = vld [vmem:[%s589_s1 + $0x28] sm:$0xff]  }
   0x6   :  { %209 = vmatpush1.bf16.msra.mxu0 %v392_v2  ;;  %379 = vmatpush1.bf16.msra.mxu1 %v392_v2 }
   0x7   :  { %210 = vmatprep.subr.bf16.mxu0 %v448_v1  ;;  %371 = vmatprep.subr.bf16.mxu1 %v448_v1 }
   0xa   :  { %211 = vmatpush1.bf16.msra.mxu0 %v393_v3  ;;  %380 = vmatpush1.bf16.msra.mxu1 %v393_v3 }
   0xb   :  { %212 = vmatprep.subr.bf16.mxu0 %v448_v1  ;;  %372 = vmatprep.subr.bf16.mxu1 %v448_v1 }
   0xe   :  { %213 = vmatpush1.bf16.msra.mxu0 %v394_v4  ;;  %381 = vmatpush1.bf16.msra.mxu1 %v394_v4 }
   0xf   :  { %214 = vmatprep.subr.bf16.mxu0 %v448_v1  ;;  %373 = vmatprep.subr.bf16.mxu1 %v448_v1 }
  0x12   :  { %215 = vmatpush1.bf16.msra.mxu0 %v395_v7  ;;  %382 = vmatpush1.bf16.msra.mxu1 %v395_v7 }
  0x13   :  { %216 = vmatprep.subr.bf16.mxu0 %v448_v1  ;;  %374 = vmatprep.subr.bf16.mxu1 %v448_v1 }
  0x14   :  { %8 = vsyncpa [#allocation3], 0  ;;  %v397_v9 = vld [vmem:[%s589_s1 + $0x30] sm:$0xff]   ;;  %v398_v10 = vld [vmem:[%s589_s1 + $0x38] sm:$0xff]  }
  0x15   :  { %v399_v11 = vld [vmem:[%s589_s1 + $0x40] sm:$0xff]   ;;  %v406_v14 = vld [vmem:[%s588_s0 + $0x14] ss:$8 sps:$4 sm:$0xff]   ;;  %v410_v16 = vld [vmem:[%s588_s0 + $0x10] ss:$8 sps:$4 sm:$0xff]  }
  0x16   :  { %217 = vmatpush1.bf16.msra.mxu0 %v396_v8  ;;  %383 = vmatpush1.bf16.msra.mxu1 %v396_v8  ;;  %v400_v12 = vld [vmem:[%s588_s0] ss:$8 sps:$4 sm:$0xff]   ;;  %v408_v15 = vld [vmem:[%s588_s0 + $0x54] ss:$8 sps:$4 sm:$0xff]   ;;  %v411_v17 = vld [vmem:[%s588_s0 + $0x50] ss:$8 sps:$4 sm:$0xff]  }
  0x17   :  { %218 = vmatprep.subr.bf16.mxu0 %v448_v1  ;;  %375 = vmatprep.subr.bf16.mxu1 %v448_v1  ;;  %v403_v13 = vld [vmem:[%s588_s0 + $0x40] ss:$8 sps:$4 sm:$0xff]   ;;  %v412_v18 = vld [vmem:[%s588_s0 + $0x24] ss:$8 sps:$4 sm:$0xff]   ;;  %v418_v22 = vld [vmem:[%s588_s0 + $0x34] ss:$8 sps:$4 sm:$0xff]  }
  0x18   :  { %v414_v19 = vld [vmem:[%s588_s0 + $0x64] ss:$8 sps:$4 sm:$0xff]   ;;  %v416_v20 = vld [vmem:[%s588_s0 + $0x20] ss:$8 sps:$4 sm:$0xff]   ;;  %v420_v23 = vld [vmem:[%s588_s0 + $0x74] ss:$8 sps:$4 sm:$0xff]  }
  0x19   :  { %v417_v21 = vld [vmem:[%s588_s0 + $0x60] ss:$8 sps:$4 sm:$0xff]   ;;  %v422_v24 = vld [vmem:[%s588_s0 + $0x30] ss:$8 sps:$4 sm:$0xff]  }
  0x1a   :  { %219 = vmatpush1.bf16.msra.mxu0 %v397_v9  ;;  %384 = vmatpush1.bf16.msra.mxu1 %v397_v9  ;;  %v423_v25 = vld [vmem:[%s588_s0 + $0x70] ss:$8 sps:$4 sm:$0xff]   ;;  %v558_v26 = vld [vmem:[%s590_s2] ss:$0 sm:$0xff]  ;;  %s449_s0 = smov [#allocation2]  }
  0x1b   :  { %220 = vmatprep.subr.bf16.mxu0 %v448_v1  ;;  %376 = vmatprep.subr.bf16.mxu1 %v448_v1  ;;  %s324_s2 = sshll.u32 %s449_s0, 4  ;;  %s325_s2 = int_to_ptr.vmem [resolvable:$true] %s324_s2 }
  0x1c   :  { %s424_s9 = scalar_lea.vmem %s325_s2, 2048  ;;  %p429_p1 = scmp.lt.s32.totalorder %s325_s2, %s325_s2 }
  0x1d   :  { %p425_p0 = scmp.ne.s32.totalorder %s325_s2, %s424_s9  ;;  %p430_p2 = scmp.lt.s32.totalorder %s424_s9, %s424_s9 }
  0x1e   :  { %221 = vmatpush1.bf16.msra.mxu0 %v398_v10  ;;  %385 = vmatpush1.bf16.msra.mxu1 %v398_v10 }
  0x1f   :  { %222 = vmatprep.subr.bf16.mxu0 %v448_v1  ;;  %377 = vmatprep.subr.bf16.mxu1 %v448_v1  ;;  %p431_p3 = por %p430_p2, %p429_p1 }
  0x21   :  { %p432_p4 = pnand %p431_p3, %p425_p0 }
  0x22   :  { %223 = vmatpush1.bf16.msra.mxu0 %v399_v11  ;;  %386 = vmatpush1.bf16.msra.mxu1 %v399_v11 }
  0x25   :  { %239 = vmatmul.mubr.bf16.vlgmr.msra.gmra.mrb[0].mxu0 %v400_v12  ;;  %271 = vmatmul.mubr.bf16.vlgmr.msra.gmra.mrb[0].mxu1 %v403_v13 }
  0x26   :  { %362 = vmatprep.mubr.msk.bf16.mxu0 %vm181_vm0, %v406_v14  ;;  %366 = vmatprep.mubr.msk.bf16.mxu1 %vm181_vm0, %v408_v15 }
  0x2d   :  { %247 = vmatmul.mubr.bf16.gmra.mrb[4].mxu0 %v410_v16  ;;  %279 = vmatmul.mubr.bf16.gmra.mrb[4].mxu1 %v411_v17 }
  0x2e   :  { %363 = vmatprep.mubr.msk.bf16.mxu0 %vm181_vm0, %v412_v18  ;;  %367 = vmatprep.mubr.msk.bf16.mxu1 %vm181_vm0, %v414_v19 }
  0x35   :  { %255 = vmatmul.mubr.bf16.gmra.mrb[8].mxu0 %v416_v20  ;;  %287 = vmatmul.mubr.bf16.gmra.mrb[8].mxu1 %v417_v21 }
  0x36   :  { %364 = vmatprep.mubr.msk.bf16.mxu0 %vm181_vm0, %v418_v22  ;;  %368 = vmatprep.mubr.msk.bf16.mxu1 %vm181_vm0, %v420_v23 }
  0x3d   :  { %263 = vmatmul.mubr.bf16.gmra.mrb[12].mxu0 %v422_v24  ;;  %295 = vmatmul.mubr.bf16.gmra.mrb[12].mxu1 %v423_v25 }
  0xf8   :  { %v240_v27 = vpop.f32.mrb[0].mxu0  ;;  %v272_v28 = vpop.f32.mrb[0].mxu1 }
  0xf9   :  { %v241_v29 = vadd.f32 %v558_v26, %v240_v27  ;;  %v273_v30 = vadd.f32 %v558_v26, %v272_v28  ;;  %v242_v31 = vpop.f32.mrb[1].mxu0  ;;  %v274_v32 = vpop.f32.mrb[1].mxu1 }
  0xfa   :  { %v243_v33 = vpop.f32.mrb[2].mxu0  ;;  %v275_v34 = vpop.f32.mrb[2].mxu1 }
  0xfb   :  { %303 = vst [vmem:[#allocation2] sm:$0xff] %v241_v29  ;;  %311 = vst [vmem:[#allocation2 + $0x40] sm:$0xff] %v273_v30  ;;  %v244_v35 = vadd.f32 %v558_v26, %v243_v33  ;;  %v276_v36 = vadd.f32 %v558_v26, %v275_v34  ;;  %v245_v37 = vpop.f32.mrb[3].mxu0  ;;  %v277_v38 = vpop.f32.mrb[3].mxu1 }
  0xfd   :  { %304 = vst [vmem:[#allocation2 + $0x8] sm:$0xff] %v244_v35  ;;  %312 = vst [vmem:[#allocation2 + $0x48] sm:$0xff] %v276_v36 }
 0x100   :  { %v248_v39 = vpop.f32.mrb[4].mxu0  ;;  %v280_v40 = vpop.f32.mrb[4].mxu1 }
 0x101   :  { %v249_v41 = vadd.f32 %v558_v26, %v248_v39  ;;  %v281_v42 = vadd.f32 %v558_v26, %v280_v40  ;;  %v250_v43 = vpop.f32.mrb[5].mxu0  ;;  %v282_v44 = vpop.f32.mrb[5].mxu1 }
 0x102   :  { %v251_v45 = vpop.f32.mrb[6].mxu0  ;;  %v283_v46 = vpop.f32.mrb[6].mxu1 }
 0x103   :  { %305 = vst [vmem:[#allocation2 + $0x10] sm:$0xff] %v249_v41  ;;  %313 = vst [vmem:[#allocation2 + $0x50] sm:$0xff] %v281_v42  ;;  %v252_v47 = vadd.f32 %v558_v26, %v251_v45  ;;  %v284_v48 = vadd.f32 %v558_v26, %v283_v46  ;;  %v253_v49 = vpop.f32.mrb[7].mxu0  ;;  %v285_v50 = vpop.f32.mrb[7].mxu1 }
 0x105   :  { %306 = vst [vmem:[#allocation2 + $0x18] sm:$0xff] %v252_v47  ;;  %314 = vst [vmem:[#allocation2 + $0x58] sm:$0xff] %v284_v48 }
 0x108   :  { %v256_v51 = vpop.f32.mrb[8].mxu0  ;;  %v288_v52 = vpop.f32.mrb[8].mxu1 }
 0x109   :  { %v257_v53 = vadd.f32 %v558_v26, %v256_v51  ;;  %v289_v54 = vadd.f32 %v558_v26, %v288_v52  ;;  %v258_v55 = vpop.f32.mrb[9].mxu0  ;;  %v290_v56 = vpop.f32.mrb[9].mxu1 }
 0x10a   :  { %v259_v57 = vpop.f32.mrb[10].mxu0  ;;  %v291_v58 = vpop.f32.mrb[10].mxu1 }
 0x10b   :  { %307 = vst [vmem:[#allocation2 + $0x20] sm:$0xff] %v257_v53  ;;  %315 = vst [vmem:[#allocation2 + $0x60] sm:$0xff] %v289_v54  ;;  %v260_v59 = vadd.f32 %v558_v26, %v259_v57  ;;  %v292_v60 = vadd.f32 %v558_v26, %v291_v58  ;;  %v261_v61 = vpop.f32.mrb[11].mxu0  ;;  %v293_v62 = vpop.f32.mrb[11].mxu1 }
 0x10d   :  { %308 = vst [vmem:[#allocation2 + $0x28] sm:$0xff] %v260_v59  ;;  %316 = vst [vmem:[#allocation2 + $0x68] sm:$0xff] %v292_v60 }
 0x110   :  { %v264_v63 = vpop.f32.mrb[12].mxu0  ;;  %v296_v0 = vpop.f32.mrb[12].mxu1 }
 0x111   :  { %v265_v1 = vadd.f32 %v558_v26, %v264_v63  ;;  %v297_v2 = vadd.f32 %v558_v26, %v296_v0  ;;  %v266_v3 = vpop.f32.mrb[13].mxu0  ;;  %v298_v4 = vpop.f32.mrb[13].mxu1 }
 0x112   :  { %v267_v5 = vpop.f32.mrb[14].mxu0  ;;  %v299_v6 = vpop.f32.mrb[14].mxu1 }
 0x113   :  { %309 = vst [vmem:[#allocation2 + $0x30] sm:$0xff] %v265_v1  ;;  %317 = vst [vmem:[#allocation2 + $0x70] sm:$0xff] %v297_v2  ;;  %v268_v7 = vadd.f32 %v558_v26, %v267_v5  ;;  %v300_v8 = vadd.f32 %v558_v26, %v299_v6  ;;  %v269_v9 = vpop.f32.mrb[15].mxu0  ;;  %v301_v10 = vpop.f32.mrb[15].mxu1 }
 0x115   :  { %310 = vst [vmem:[#allocation2 + $0x38] sm:$0xff] %v268_v7  ;;  %318 = vst [vmem:[#allocation2 + $0x78] sm:$0xff] %v300_v8 }
 0x116   :  { %435 = shalt.err (!%p432_p4)
}
 0x117   :  { %s436_s12 = scalar_lea.hbm %s591_s3, 2048 }
 0x118   :  { %p437_p5 = scmp.ne.s32.totalorder %s591_s3, %s436_s12  ;;  %p440_p6 = scmp.lt.u32.totalorder %s436_s12, %s591_s3 }
 0x11a   :  { %p442_p7 = pnand %p440_p6, %p437_p5 }
 0x11c   :  { %445 = shalt.err (!%p442_p7)
}
 0x11d   :  { %s450_s16 = smov 128   ;;  %s451_s17 = smov 8  }
 0x11e   :  { %330 = dma.vmem_to_hbm [thread:$0]  %s325_s2, 2048, %s591_s3, [#allocation3], %s450_s16, %s450_s16, %s451_s17  }
 0x11f   :  { %446 = dma.done.wait [#allocation3], 2048  }
 0x120   :  { %447 = vsyncadd [#allocation3], 4294965248 }
 0x121   :  { %334 = vsyncpa [#allocation3], 1 }

</bundles_post_ra>
